<compile_context>
chip_gen: v7x
topology: tpu7x:2x2x1
jax: 0.10.0
libtpu: 0.0.40
codegen_flags: <defaults>
</compile_context>

<pallas_src>
import functools

import jax
import jax.numpy as jnp
from jax import lax
from jax.experimental import pallas as pl
from jax.experimental.pallas import tpu as pltpu


# --------------------------------------------------------------------------
# Kernel 1: per-batch non-local attention, (C, HW) channels-on-sublanes layout.
#   inputs : x     (1, C, HW)        native NCHW view (no wrapper transpose)
#            wall  (3*C2, C)         [wg; wphi; wtheta] fused 1x1-conv weights
#            ball  (3*C2, 1)         fused biases
#   output : y_t   (1, HW, C2) bf16  == torch `y.transpose(1, 2).contiguous()`
# --------------------------------------------------------------------------
def _attn_kernel(x_ref, wall_ref, ball_ref, yt_ref, *, c2):
    xb = x_ref[0]                                              # (C, HW)

    # fused g/phi/theta 1x1 convs: one MXU matmul, HW on lanes (lane-dense)
    proj = jnp.dot(wall_ref[...], xb,
                   preferred_element_type=jnp.float32) + ball_ref[...]
    g = proj[:c2]                                              # (C2, HW)
    phi = proj[c2:2 * c2]                                      # (C2, HW)
    theta = proj[2 * c2:3 * c2]                                # (C2, HW)

    # fT[j, i] = f[i, j] = sum_hw theta[i, hw] * phi[j, hw]   (contract over HW)
    fT = lax.dot_general(phi, theta, (((1,), (1,)), ((), ())),
                         preferred_element_type=jnp.float32)   # (C2, C2)

    # softmax over torch dim -1  ==  axis 0 of fT   (kept in f32)
    fT = fT - jnp.max(fT, axis=0, keepdims=True)
    e = jnp.exp(fT)
    pT = e / jnp.sum(e, axis=0, keepdims=True)                 # (C2, C2)

    # y_t[hw, i] = sum_j g[j, hw] * pT[j, i]   == torch y.transpose(1, 2)
    y_t = lax.dot_general(g, pT, (((0,), (0,)), ((), ())),
                          preferred_element_type=jnp.float32)  # (HW, C2)
    yt_ref[0] = y_t.astype(yt_ref.dtype)


# --------------------------------------------------------------------------
# Kernel 2: fused w-projection + BatchNorm affine + residual (lane-dense tiles).
#   inputs : x     (1, C, T)    NCHW tile
#            y     (1, C2, T)   scrambled y tile (bf16)
#            ww    (C, C2)      w 1x1-conv weight
#            a     (C, 1)       gamma / sqrt(var + eps)
#            c0    (C, 1)       (bw - mean) * a + beta
#   output : z     (1, C, T)    NCHW tile (residual already added)
# --------------------------------------------------------------------------
def _wproj_bn_res_kernel(x_ref, y_ref, ww_ref, a_ref, c0_ref, o_ref):
    yv = y_ref[0].astype(jnp.float32)                          # (C2, T)
    wy = jnp.dot(ww_ref[...], yv,
                 preferred_element_type=jnp.float32)           # (C, T)
    o_ref[0] = (x_ref[0] + wy * a_ref[...] + c0_ref[...]).astype(o_ref.dtype)


def _pick_tile(hw):
    for t in (2048, 1024, 512, 256, 128):
        if hw % t == 0:
            return t
    return hw


# --------------------------------------------------------------------------
# Wrapper
# --------------------------------------------------------------------------
@jax.jit
def non_local_block(x, params):
    B, C, H, W = x.shape
    C2 = C // 2
    HW = H * W
    N = B * HW

    x4 = x.astype(jnp.float32).reshape(B, C, HW)     # free view of NCHW

    # fused projection weights / biases
    wall = jnp.concatenate(
        [params["wg"], params["wphi"], params["wtheta"]], axis=0)     # (3C2, C)
    ball = jnp.concatenate(
        [params["bg"], params["bphi"], params["btheta"]], axis=1
    ).reshape(3 * C2, 1)                                               # (3C2, 1)

    # ---- kernel 1: per-batch attention -----------------------------------
    flops1 = B * 2 * HW * (3 * C2 * C + 2 * C2 * C2)
    bytes1 = (B * C * HW * 4) + (3 * C2 * C * 4) + (3 * C2 * 4) + (B * HW * C2 * 2)
    y_t = pl.pallas_call(
        functools.partial(_attn_kernel, c2=C2),
        out_shape=jax.ShapeDtypeStruct((B, HW, C2), jnp.bfloat16),
        grid_spec=pltpu.PrefetchScalarGridSpec(
            num_scalar_prefetch=0,
            grid=(B,),
            in_specs=[
                pl.BlockSpec((1, C, HW), lambda b: (b, 0, 0)),
                pl.BlockSpec((3 * C2, C), lambda b: (0, 0)),
                pl.BlockSpec((3 * C2, 1), lambda b: (0, 0)),
            ],
            out_specs=pl.BlockSpec((1, HW, C2), lambda b: (b, 0, 0)),
        ),
        compiler_params=pltpu.CompilerParams(
            dimension_semantics=("parallel",),
            vmem_limit_bytes=32 * 1024 * 1024),
        cost_estimate=pl.CostEstimate(
            flops=flops1, transcendentals=B * C2 * C2, bytes_accessed=bytes1),
    )(x4, wall, ball)

    # ---- free reinterpretation: torch transpose(1,2).contiguous().view ----
    # y_t's row-major memory is already the "contiguous" order, so .view is a
    # plain row-major reshape (bitcast, no HBM traffic).
    y_scr = y_t.reshape(B, C2, HW)

    # ---- BN batch statistics of wy = ww @ y_scr + bw, via linearity -------
    # (tiny (C2,), (C2,C2) reductions; avoids materializing the full wy)
    hp = lax.Precision.HIGHEST
    yf = y_scr.astype(jnp.float32)
    s = jnp.sum(yf, axis=(0, 2))                                # (C2,)
    M = jnp.einsum("bcp,bdp->cd", yf, yf, precision=hp)         # (C2, C2)
    ww = params["ww"]                                           # (C, C2)
    bw = params["bw"][0]                                        # (C,)
    wws = jnp.dot(ww, s, precision=hp)                          # (C,)
    mean = (wws + N * bw) / N
    quad = jnp.sum(jnp.matmul(ww, M, precision=hp) * ww, axis=1)
    e2 = (quad + 2.0 * bw * wws + N * bw * bw) / N
    var = e2 - mean * mean                                      # biased (torch BN)
    a = params["gamma"][0] * lax.rsqrt(var + 1e-5)
    c0 = (bw - mean) * a + params["beta"][0]
    a_col = a.reshape(C, 1).astype(jnp.float32)
    c0_col = c0.reshape(C, 1).astype(jnp.float32)

    # ---- kernel 2: w-projection + BN affine + residual, tiled over HW -----
    T = _pick_tile(HW)
    grid2 = (B, HW // T)
    flops2 = N * (2 * C * C2 + 3 * C)
    bytes2 = (B * C * HW * 4) + (B * C2 * HW * 2) + (C * C2 * 4) \
        + (2 * C * 4) + (B * C * HW * 4)
    z4 = pl.pallas_call(
        _wproj_bn_res_kernel,
        out_shape=jax.ShapeDtypeStruct((B, C, HW), jnp.float32),
        grid_spec=pltpu.PrefetchScalarGridSpec(
            num_scalar_prefetch=0,
            grid=grid2,
            in_specs=[
                pl.BlockSpec((1, C, T), lambda b, t: (b, 0, t)),
                pl.BlockSpec((1, C2, T), lambda b, t: (b, 0, t)),
                pl.BlockSpec((C, C2), lambda b, t: (0, 0)),
                pl.BlockSpec((C, 1), lambda b, t: (0, 0)),
                pl.BlockSpec((C, 1), lambda b, t: (0, 0)),
            ],
            out_specs=pl.BlockSpec((1, C, T), lambda b, t: (b, 0, t)),
        ),
        compiler_params=pltpu.CompilerParams(
            dimension_semantics=("parallel", "parallel"),
            vmem_limit_bytes=32 * 1024 * 1024),
        cost_estimate=pl.CostEstimate(
            flops=flops2, transcendentals=0, bytes_accessed=bytes2),
    )(x4, y_scr, ww, a_col, c0_col)

    return z4.reshape(B, C, H, W)                               # free view


# --------------------------------------------------------------------------
# Pure-JAX reference (mirrors the PyTorch forward, training-mode BN)
# --------------------------------------------------------------------------
def non_local_block_reference(x, params):
    B, C, H, W = x.shape
    C2 = C // 2
    hp = jax.lax.Precision.HIGHEST

    def conv1x1(inp, w, b):
        return (jnp.einsum("bchw,oc->bohw", inp, w, precision=hp)
                + b[0][None, :, None, None])

    g_x = conv1x1(x, params["wg"], params["bg"]).reshape(B, C2, H * W)
    phi_x = conv1x1(x, params["wphi"], params["bphi"]).reshape(B, C2, H * W)
    phi_x = jnp.transpose(phi_x, (0, 2, 1))
    theta_x = conv1x1(x, params["wtheta"], params["btheta"]).reshape(B, C2, H * W)
    f = jnp.einsum("bij,bjk->bik", theta_x, phi_x, precision=hp)
    fs = jax.nn.softmax(f, axis=-1)
    y = jnp.einsum("bij,bjk->bik", fs, g_x, precision=hp)
    y = jnp.transpose(y, (0, 2, 1)).reshape(B, C2, H, W)
    wy = conv1x1(y, params["ww"], params["bw"])
    mean = wy.mean(axis=(0, 2, 3), keepdims=True)
    var = ((wy - mean) ** 2).mean(axis=(0, 2, 3), keepdims=True)
    bn = ((wy - mean) / jnp.sqrt(var + 1e-5)
          * params["gamma"][0][None, :, None, None]
          + params["beta"][0][None, :, None, None])
    return x + bn


# --------------------------------------------------------------------------
def make_params(key, ch):
    C = ch
    C2 = ch // 2
    ks = jax.random.split(key, 10)
    return {
        "wg": jax.random.normal(ks[0], (C2, C), jnp.float32) / jnp.sqrt(C),
        "bg": 0.01 * jax.random.normal(ks[1], (1, C2), jnp.float32),
        "wphi": jax.random.normal(ks[2], (C2, C), jnp.float32) / jnp.sqrt(C),
        "bphi": 0.01 * jax.random.normal(ks[3], (1, C2), jnp.float32),
        "wtheta": jax.random.normal(ks[4], (C2, C), jnp.float32) / jnp.sqrt(C),
        "btheta": 0.01 * jax.random.normal(ks[5], (1, C2), jnp.float32),
        "ww": jax.random.normal(ks[6], (C, C2), jnp.float32) / jnp.sqrt(C2),
        "bw": 0.01 * jax.random.normal(ks[7], (1, C), jnp.float32),
        "gamma": 1.0 + 0.1 * jax.random.normal(ks[8], (1, C), jnp.float32),
        "beta": 0.1 * jax.random.normal(ks[9], (1, C), jnp.float32),
    }


if __name__ == "__main__":
    B, C, H, W = 2, 32, 16, 16   # module default ch=32 (C2=16), 16x16 spatial

    key = jax.random.PRNGKey(0)
    kx, kp = jax.random.split(key)
    x = jax.random.normal(kx, (B, C, H, W), jnp.float32)
    params = make_params(kp, C)

    z = non_local_block(x, params)
    z = jax.block_until_ready(z)

    z_ref = non_local_block_reference(x, params)
    assert z.shape == (B, C, H, W)
    assert jnp.allclose(z, z_ref, rtol=1e-2, atol=1e-2), (
        float(jnp.max(jnp.abs(z - z_ref))))

    print("KERNEL_OK")
</pallas_src>

<mosaic_0001>
module attributes {stable_mosaic.version = 11 : i64} {
  func.func @_attn_kernel(%arg0: i32, %arg1: memref<1x32x256xf32, #tpu.memory_space<vmem>>, %arg2: memref<48x32xf32, #tpu.memory_space<vmem>>, %arg3: memref<48x1xf32, #tpu.memory_space<vmem>>, %arg4: memref<1x256x16xbf16, #tpu.memory_space<vmem>>) attributes {dimension_semantics = [#tpu.dimension_semantics<parallel>], iteration_bounds = array<i64: 2>, scalar_prefetch = 0 : i64, scratch_operands = 0 : i64, tpu.core_type = #tpu.core_type<tc>, window_params = [{transform_indices = @transform_0, window_bounds = array<i64: 1, 32, 256>}, {pipeline_mode = #tpu.pipeline_mode<synchronous>, transform_indices = @transform_1, window_bounds = array<i64: 48, 32>}, {pipeline_mode = #tpu.pipeline_mode<synchronous>, transform_indices = @transform_2, window_bounds = array<i64: 48, 1>}, {transform_indices = @transform_3, window_bounds = array<i64: 1, 256, 16>}]} {
    %c0 = arith.constant 0 : index
    %c0_0 = arith.constant 0 : index
    %c0_1 = arith.constant 0 : index
    %0 = vector.load %arg1[%c0, %c0_0, %c0_1] : memref<1x32x256xf32, #tpu.memory_space<vmem>>, vector<1x32x256xf32>
    %1 = vector.shape_cast %0 : vector<1x32x256xf32> to vector<32x256xf32>
    %c0_2 = arith.constant 0 : index
    %c0_3 = arith.constant 0 : index
    %2 = vector.load %arg2[%c0_2, %c0_3] : memref<48x32xf32, #tpu.memory_space<vmem>>, vector<48x32xf32>
    %cst = arith.constant dense<0.000000e+00> : vector<48x256xf32>
    %3 = tpu.matmul %2, %1, %cst {dimension_numbers = #tpu.dot_dimension_numbers<[1], [0], [0], [1], [0, 0, 1, 1], [], []>} : vector<48x32xf32>, vector<32x256xf32>, vector<48x256xf32> -> vector<48x256xf32>
    %c0_4 = arith.constant 0 : index
    %c0_5 = arith.constant 0 : index
    %4 = vector.load %arg3[%c0_4, %c0_5] : memref<48x1xf32, #tpu.memory_space<vmem>>, vector<48x1xf32>
    %5 = vector.broadcast %4 : vector<48x1xf32> to vector<48x256xf32>
    %6 = arith.addf %3, %5 : vector<48x256xf32>
    %7 = vector.extract_strided_slice %6 {offsets = [0, 0], sizes = [16, 256], strides = [1, 1]} : vector<48x256xf32> to vector<16x256xf32>
    %8 = vector.extract_strided_slice %6 {offsets = [16, 0], sizes = [16, 256], strides = [1, 1]} : vector<48x256xf32> to vector<16x256xf32>
    %9 = vector.extract_strided_slice %6 {offsets = [32, 0], sizes = [16, 256], strides = [1, 1]} : vector<48x256xf32> to vector<16x256xf32>
    %cst_6 = arith.constant dense<0.000000e+00> : vector<16x16xf32>
    %10 = tpu.matmul %8, %9, %cst_6 {dimension_numbers = #tpu.dot_dimension_numbers<[1], [1], [0], [0], [0, 0, 1, 0], [], []>} : vector<16x256xf32>, vector<16x256xf32>, vector<16x16xf32> -> vector<16x16xf32>
    %cst_7 = arith.constant dense<0xFF800000> : vector<16xf32>
    %11 = vector.multi_reduction <maximumf>, %10, %cst_7 [0] : vector<16x16xf32> to vector<16xf32>
    %12 = vector.shape_cast %11 : vector<16xf32> to vector<1x16xf32>
    %13 = vector.broadcast %12 : vector<1x16xf32> to vector<16x16xf32>
    %14 = arith.subf %10, %13 : vector<16x16xf32>
    %15 = math.exp %14 : vector<16x16xf32>
    %cst_8 = arith.constant dense<0.000000e+00> : vector<16xf32>
    %16 = vector.multi_reduction <add>, %15, %cst_8 [0] : vector<16x16xf32> to vector<16xf32>
    %17 = vector.shape_cast %16 : vector<16xf32> to vector<1x16xf32>
    %18 = vector.broadcast %17 : vector<1x16xf32> to vector<16x16xf32>
    %19 = arith.divf %15, %18 : vector<16x16xf32>
    %cst_9 = arith.constant dense<0.000000e+00> : vector<256x16xf32>
    %20 = tpu.matmul %7, %19, %cst_9 {dimension_numbers = #tpu.dot_dimension_numbers<[0], [0], [1], [1], [0, 1, 1, 1], [], []>} : vector<16x256xf32>, vector<16x16xf32>, vector<256x16xf32> -> vector<256x16xf32>
    %21 = arith.truncf %20 : vector<256x16xf32> to vector<256x16xbf16>
    %c0_10 = arith.constant 0 : index
    %c0_11 = arith.constant 0 : index
    %c0_12 = arith.constant 0 : index
    %22 = vector.load %arg4[%c0_10, %c0_11, %c0_12] : memref<1x256x16xbf16, #tpu.memory_space<vmem>>, vector<1x256x16xbf16>
    %23 = vector.shape_cast %22 : vector<1x256x16xbf16> to vector<256x16xbf16>
    %24 = vector.shape_cast %21 : vector<256x16xbf16> to vector<1x256x16xbf16>
    tpu.vector_store %arg4[%c0_10, %c0_11, %c0_12], %24 {strides = array<i32>} : memref<1x256x16xbf16, #tpu.memory_space<vmem>>, vector<1x256x16xbf16>,
    return
  }
  func.func @transform_0(%arg0: i32) -> (i32, i32, i32) {
    %c0_i32 = arith.constant 0 : i32
    %c0_i32_0 = arith.constant 0 : i32
    %c0_i32_1 = arith.constant 0 : i32
    return %arg0, %c0_i32, %c0_i32_0 : i32, i32, i32
  }
  func.func @transform_1(%arg0: i32) -> (i32, i32) {
    %c0_i32 = arith.constant 0 : i32
    %c0_i32_0 = arith.constant 0 : i32
    %c0_i32_1 = arith.constant 0 : i32
    return %c0_i32, %c0_i32_0 : i32, i32
  }
  func.func @transform_2(%arg0: i32) -> (i32, i32) {
    %c0_i32 = arith.constant 0 : i32
    %c0_i32_0 = arith.constant 0 : i32
    %c0_i32_1 = arith.constant 0 : i32
    return %c0_i32, %c0_i32_0 : i32, i32
  }
  func.func @transform_3(%arg0: i32) -> (i32, i32, i32) {
    %c0_i32 = arith.constant 0 : i32
    %c0_i32_0 = arith.constant 0 : i32
    %c0_i32_1 = arith.constant 0 : i32
    return %arg0, %c0_i32, %c0_i32_0 : i32, i32, i32
  }
}

module attributes {stable_mosaic.version = 11 : i64} {
  func.func @_wproj_bn_res_kernel(%arg0: i32, %arg1: i32, %arg2: memref<1x32x256xf32, #tpu.memory_space<vmem>>, %arg3: memref<1x16x256xbf16, #tpu.memory_space<vmem>>, %arg4: memref<32x16xf32, #tpu.memory_space<vmem>>, %arg5: memref<32x1xf32, #tpu.memory_space<vmem>>, %arg6: memref<32x1xf32, #tpu.memory_space<vmem>>, %arg7: memref<1x32x256xf32, #tpu.memory_space<vmem>>) attributes {dimension_semantics = [#tpu.dimension_semantics<parallel>, #tpu.dimension_semantics<parallel>], iteration_bounds = array<i64: 2, 1>, scalar_prefetch = 0 : i64, scratch_operands = 0 : i64, tpu.core_type = #tpu.core_type<tc>, window_params = [{transform_indices = @transform_0, window_bounds = array<i64: 1, 32, 256>}, {transform_indices = @transform_1, window_bounds = array<i64: 1, 16, 256>}, {pipeline_mode = #tpu.pipeline_mode<synchronous>, transform_indices = @transform_2, window_bounds = array<i64: 32, 16>}, {pipeline_mode = #tpu.pipeline_mode<synchronous>, transform_indices = @transform_3, window_bounds = array<i64: 32, 1>}, {pipeline_mode = #tpu.pipeline_mode<synchronous>, transform_indices = @transform_4, window_bounds = array<i64: 32, 1>}, {transform_indices = @transform_5, window_bounds = array<i64: 1, 32, 256>}]} {
    %c0 = arith.constant 0 : index
    %c0_0 = arith.constant 0 : index
    %c0_1 = arith.constant 0 : index
    %0 = vector.load %arg3[%c0, %c0_0, %c0_1] : memref<1x16x256xbf16, #tpu.memory_space<vmem>>, vector<1x16x256xbf16>
    %1 = vector.shape_cast %0 : vector<1x16x256xbf16> to vector<16x256xbf16>
    %2 = arith.extf %1 : vector<16x256xbf16> to vector<16x256xf32>
    %c0_2 = arith.constant 0 : index
    %c0_3 = arith.constant 0 : index
    %3 = vector.load %arg4[%c0_2, %c0_3] : memref<32x16xf32, #tpu.memory_space<vmem>>, vector<32x16xf32>
    %cst = arith.constant dense<0.000000e+00> : vector<32x256xf32>
    %4 = tpu.matmul %3, %2, %cst {dimension_numbers = #tpu.dot_dimension_numbers<[1], [0], [0], [1], [0, 0, 1, 1], [], []>} : vector<32x16xf32>, vector<16x256xf32>, vector<32x256xf32> -> vector<32x256xf32>
    %c0_4 = arith.constant 0 : index
    %c0_5 = arith.constant 0 : index
    %c0_6 = arith.constant 0 : index
    %5 = vector.load %arg2[%c0_4, %c0_5, %c0_6] : memref<1x32x256xf32, #tpu.memory_space<vmem>>, vector<1x32x256xf32>
    %6 = vector.shape_cast %5 : vector<1x32x256xf32> to vector<32x256xf32>
    %c0_7 = arith.constant 0 : index
    %c0_8 = arith.constant 0 : index
    %7 = vector.load %arg5[%c0_7, %c0_8] : memref<32x1xf32, #tpu.memory_space<vmem>>, vector<32x1xf32>
    %8 = vector.broadcast %7 : vector<32x1xf32> to vector<32x256xf32>
    %9 = arith.mulf %4, %8 : vector<32x256xf32>
    %10 = arith.addf %6, %9 : vector<32x256xf32>
    %c0_9 = arith.constant 0 : index
    %c0_10 = arith.constant 0 : index
    %11 = vector.load %arg6[%c0_9, %c0_10] : memref<32x1xf32, #tpu.memory_space<vmem>>, vector<32x1xf32>
    %12 = vector.broadcast %11 : vector<32x1xf32> to vector<32x256xf32>
    %13 = arith.addf %10, %12 : vector<32x256xf32>
    %c0_11 = arith.constant 0 : index
    %c0_12 = arith.constant 0 : index
    %c0_13 = arith.constant 0 : index
    %14 = vector.load %arg7[%c0_11, %c0_12, %c0_13] : memref<1x32x256xf32, #tpu.memory_space<vmem>>, vector<1x32x256xf32>
    %15 = vector.shape_cast %14 : vector<1x32x256xf32> to vector<32x256xf32>
    %16 = vector.shape_cast %13 : vector<32x256xf32> to vector<1x32x256xf32>
    tpu.vector_store %arg7[%c0_11, %c0_12, %c0_13], %16 {strides = array<i32>} : memref<1x32x256xf32, #tpu.memory_space<vmem>>, vector<1x32x256xf32>,
    return
  }
  func.func @transform_0(%arg0: i32, %arg1: i32) -> (i32, i32, i32) {
    %c0_i32 = arith.constant 0 : i32
    %c0_i32_0 = arith.constant 0 : i32
    return %arg0, %c0_i32, %arg1 : i32, i32, i32
  }
  func.func @transform_1(%arg0: i32, %arg1: i32) -> (i32, i32, i32) {
    %c0_i32 = arith.constant 0 : i32
    %c0_i32_0 = arith.constant 0 : i32
    return %arg0, %c0_i32, %arg1 : i32, i32, i32
  }
  func.func @transform_2(%arg0: i32, %arg1: i32) -> (i32, i32) {
    %c0_i32 = arith.constant 0 : i32
    %c0_i32_0 = arith.constant 0 : i32
    %c0_i32_1 = arith.constant 0 : i32
    return %c0_i32, %c0_i32_0 : i32, i32
  }
  func.func @transform_3(%arg0: i32, %arg1: i32) -> (i32, i32) {
    %c0_i32 = arith.constant 0 : i32
    %c0_i32_0 = arith.constant 0 : i32
    %c0_i32_1 = arith.constant 0 : i32
    return %c0_i32, %c0_i32_0 : i32, i32
  }
  func.func @transform_4(%arg0: i32, %arg1: i32) -> (i32, i32) {
    %c0_i32 = arith.constant 0 : i32
    %c0_i32_0 = arith.constant 0 : i32
    %c0_i32_1 = arith.constant 0 : i32
    return %c0_i32, %c0_i32_0 : i32, i32
  }
  func.func @transform_5(%arg0: i32, %arg1: i32) -> (i32, i32, i32) {
    %c0_i32 = arith.constant 0 : i32
    %c0_i32_0 = arith.constant 0 : i32
    return %arg0, %c0_i32, %arg1 : i32, i32, i32
  }
}

</mosaic_0001>

<bundles_post_ra>
// kernel: non_local_block.2
= control target key start
LH: loop header
LB: loop body
LE: loop exit
PB: predicated region body
PF: predicated region fallthrough
CT: control target
= control target key end

     0   :  { %s1119_s12 = smov 0   ;;  %s1285_s0 = inlined_call_operand.vmem [shape: f32[2,32,256], index: 0, kind: input, shape index: {}]   ;;  %s1286_s1 = inlined_call_operand.vmem [shape: f32[48,32], index: 1, kind: input, shape index: {}]   ;;  %s1287_s2 = inlined_call_operand.vmem [shape: f32[48,1], index: 2, kind: input, shape index: {}]   ;;  %s1288_s3 = inlined_call_operand.vmem [shape: bf16[2,256,16], index: 3, kind: output, shape index: {}]  }
   0x1 LB: > { %s916_s13 = sadd.s32 4294967295, %s1095_s12   ;;  %p920_p0 = scmp.ge.s32.totalorder %s1095_s12, 1  ;;  %s1095_s12 = sphi %s1119_s12, %s13_s12  }
   0x2   : > { %p137_p1 = scmp.lt.s32.totalorder %s1095_s12, 3 }
   0x4   : > { %p138_p2 = pnand %p920_p0, %p137_p1 }
   0x5   : > { %p161_p3 = scmp.lt.s32.totalorder (!%p138_p2), %s916_s13, 1  ;;  %v1097_v0 = vmov (!%p138_p2), 0.0   ;;  %v1098_v1 = vmov (!%p138_p2), 0   ;;  %v189_v2 = vld [vmem:[%s1287_s2 + $0x20] sm:$0xff] (!%p138_p2)  ;;  %v187_v3 = vld [vmem:[%s1287_s2 + $0x10] sm:$0xff] (!%p138_p2)  ;;  %v190_v4 = vld [vmem:[%s1287_s2 + $0x28] sm:$0xff] (!%p138_p2) }
   0x6   : > { %141 = sbr.rel (%p138_p2) target bundleno = 805 (0x325), region = 32  ;;  %304 = vmatprep.mubr.f32.mxu0 (!%p138_p2), %v1097_v0  ;;  %1081 = vset.pattern.permute.xlu0 (!%p138_p2), %v1098_v1  ;;  %v188_v5 = vld [vmem:[%s1287_s2 + $0x18] sm:$0xff] (!%p138_p2)  ;;  %v185_v17 = vld [vmem:[%s1287_s2] sm:$0xff] (!%p138_p2)  ;;  %v186_v18 = vld [vmem:[%s1287_s2 + $0x8] sm:$0xff] (!%p138_p2)  ;;  %vm221_vm0 = vcmask (!%p138_p2), 261120   ;;  %vm416_vm1 = vcmask (!%p138_p2), 130048  }
   0x7   : > { %1082 = vset.pattern.permute.xlu1 (!%p138_p2), %v1098_v1  ;;  %213 = vperm.xlu0 (!%p138_p2), %1081, %v189_v2   ;;  %v179_v20 = vld [vmem:[%s1286_s1] sm:$0xff] (!%p138_p2)  ;;  %v180_v21 = vld [vmem:[%s1286_s1 + $0x8] sm:$0xff] (!%p138_p2)  ;;  %v181_v22 = vld [vmem:[%s1286_s1 + $0x10] sm:$0xff] (!%p138_p2) }
   0x8   : > { %203 = vperm.xlu1 (!%p138_p2), %1082, %v187_v3   ;;  %v182_v23 = vld [vmem:[%s1286_s1 + $0x18] sm:$0xff] (!%p138_p2)  ;;  %v183_v24 = vld [vmem:[%s1286_s1 + $0x20] sm:$0xff] (!%p138_p2)  ;;  %v184_v25 = vld [vmem:[%s1286_s1 + $0x28] sm:$0xff] (!%p138_p2) }
   0xb   : > { %218 = vperm.xlu0 (!%p138_p2), %1081, %v190_v4  }
   0xc   : > { %208 = vperm.xlu1 (!%p138_p2), %1082, %v188_v5  }
   0xd   : > { %s1290_s13 = smov (!%p161_p3, %s916_s13), 1 }
   0xe   : > { %s965_s18 = sshll.u32 %s1290_s13, 6  ;;  %s966_s17 = sshll.u32 %s1290_s13, 7 }
   0xf   : > { %s165_s25 = scalar_lea.vmem %s1285_s0, %s965_s18  ;;  %193 = vperm.xlu0 %1081, %v185_v17   ;;  %s1248_s20 = scalar_lea.vmem %s1288_s3, %s966_s17 }
  0x10   : > { %v172_v6 = vld [vmem:[%s165_s25 + $0x8] sm:$0xff]  ;;  %v174_v7 = vld [vmem:[%s165_s25 + $0x18] sm:$0xff]  ;;  %v171_v8 = vld [vmem:[%s165_s25] sm:$0xff]  ;;  %198 = vperm.xlu1 %1082, %v186_v18  }
  0x11   : > { %v1053_v9 = vpack.c.bf16 %v174_v7, %v172_v6  ;;  %v173_v10 = vld [vmem:[%s165_s25 + $0x10] sm:$0xff]  ;;  %v176_v11 = vld [vmem:[%s165_s25 + $0x28] sm:$0xff]  ;;  %v178_v12 = vld [vmem:[%s165_s25 + $0x38] sm:$0xff] }
  0x12   : > { %v1055_v13 = vpack.c.bf16 %v173_v10, %v171_v8  ;;  %v1057_v14 = vpack.c.bf16 %v178_v12, %v176_v11  ;;  %v175_v15 = vld [vmem:[%s165_s25 + $0x20] sm:$0xff]  ;;  %v177_v16 = vld [vmem:[%s165_s25 + $0x30] sm:$0xff] }
  0x13   : > { %1054 = vmatprep.subr.bf16.mxu0 %v1053_v9  ;;  %v1059_v19 = vpack.c.bf16 %v177_v16, %v175_v15 }
  0x14   : > { %1056 = vmatpush1.bf16.msra.mxu0 %v1055_v13 }
  0x15   : > { %1058 = vmatprep.subr.bf16.mxu0 %v1057_v14 }
  0x18   : > { %1060 = vmatpush1.bf16.msra.mxu0 %v1059_v19 }
  0x1b   : > { %925 = vmatmul.mubr.msk.f32.vlgmr.msra.gmra.mrb[0].mxu0 %vm221_vm0, %v179_v20 }
  0x1c   : > { %310 = vmatprep.mubr.f32.mxu0 %v1097_v0 }
  0x1f   : > { %926 = vmatmul.mubr.msk.f32.gmra.mrb[2].mxu0 %vm221_vm0, %v180_v21 }
  0x20   : > { %316 = vmatprep.mubr.f32.mxu0 %v1097_v0 }
  0x23   : > { %927 = vmatmul.mubr.msk.f32.gmra.mrb[4].mxu0 %vm221_vm0, %v181_v22 }
  0x24   : > { %322 = vmatprep.mubr.f32.mxu0 %v1097_v0 }
  0x27   : > { %928 = vmatmul.mubr.msk.f32.gmra.mrb[6].mxu0 %vm221_vm0, %v182_v23 }
  0x28   : > { %328 = vmatprep.mubr.f32.mxu0 %v1097_v0 }
  0x2b   : > { %929 = vmatmul.mubr.msk.f32.gmra.mrb[8].mxu0 %vm221_vm0, %v183_v24 }
  0x2c   : > { %334 = vmatprep.mubr.f32.mxu0 %v1097_v0 }
  0x2f   : > { %930 = vmatmul.mubr.msk.f32.gmra.mrb[10].mxu0 %vm221_vm0, %v184_v25 }
  0x86   : > { %v214_v26 = vpop.permute.xlu0 %213 }
  0x87   : > { %v204_v27 = vpop.permute.xlu1 %203 }
  0x8a   : > { %v219_v28 = vpop.permute.xlu0 %218 }
  0x8b   : > { %v209_v29 = vpop.permute.xlu1 %208 }
  0x8e   : > { %v194_v30 = vpop.permute.xlu0 %193 }
  0x8f   : > { %v199_v35 = vpop.permute.xlu1 %198 }
  0xee   : > { %v306_v31 = vpop.f32.mrb[0].mxu0 }
  0xef   : > { %v307_v32 = vadd.f32 %v306_v31, %v194_v30  ;;  %v308_v33 = vpop.f32.mrb[1].mxu0 }
  0xf0   : > { %v309_v34 = vadd.f32 %v308_v33, %v194_v30 }
  0xf1   : > { %444 = vxpose.xlu0.b32.start [1/2] (short) %v307_v32, 128 }
  0xf2   : > { %v312_v36 = vpop.f32.mrb[2].mxu0  ;;  %476 = vxpose.xlu1.b32.start [1/2] (short) %v309_v34, 128 }
  0xf3   : > { %v313_v37 = vadd.f32 %v312_v36, %v199_v35  ;;  %v314_v38 = vpop.f32.mrb[3].mxu0 }
  0xf4   : > { %v315_v39 = vadd.f32 %v314_v38, %v199_v35 }
  0xf5   : > { %445 = vxpose.xlu0.b32.end [2/2] (short) %v313_v37, 128 }
  0xf6   : > { %v318_v40 = vpop.f32.mrb[4].mxu0  ;;  %477 = vxpose.xlu1.b32.end [2/2] (short) %v315_v39, 128 }
  0xf7   : > { %v320_v41 = vpop.f32.mrb[5].mxu0  ;;  %v319_v55 = vadd.f32 %v318_v40, %v204_v27 }
  0xf8   : > { %v321_v42 = vadd.f32 %v320_v41, %v204_v27 }
  0xfa   : > { %v324_v43 = vpop.f32.mrb[6].mxu0  ;;  %405 = vmatprep.mubr.f32.mxu1 %v321_v42 }
  0xfb   : > { %v326_v44 = vpop.f32.mrb[7].mxu0  ;;  %v325_v57 = vadd.f32 %v324_v43, %v209_v29 }
  0xfc   : > { %v327_v56 = vadd.f32 %v326_v44, %v209_v29 }
  0xfe   : > { %v330_v45 = vpop.f32.mrb[8].mxu0 }
  0xff   : > { %v332_v46 = vpop.f32.mrb[9].mxu0  ;;  %v331_v48 = vadd.f32 %v330_v45, %v214_v26 }
 0x100   : > { %v333_v51 = vadd.f32 %v332_v46, %v214_v26 }
 0x102   : > { %v336_v47 = vpop.f32.mrb[10].mxu0 }
 0x103   : > { %v337_v49 = vadd.f32 %v336_v47, %v219_v28  ;;  %v338_v50 = vpop.f32.mrb[11].mxu0 }
 0x104   : > { %v339_v52 = vadd.f32 %v338_v50, %v219_v28 }
 0x105   : > { %v1063_v53 = vpack.c.bf16 %v337_v49, %v331_v48 }
 0x106   : > { %v1061_v54 = vpack.c.bf16 %v339_v52, %v333_v51 }
 0x108   : > { %1062 = vmatprep.subr.bf16.mxu1 %v1061_v54 }
 0x109   : > { %1064 = vmatpush1.bf16.xpose.msra.mxu1 %v1063_v53 }
 0x110   : > { %406 = vmatmul.mubr.f32.vlgmr.msra.gmra.mrb[0].mxu1 %v319_v55 }
 0x111   : > { %410 = vmatprep.mubr.f32.mxu1 %v327_v56 }
 0x114   : > { %411 = vmatmul.mubr.f32.gmra.mrb[2].mxu1 %v325_v57 }
 0x171   : > { %v460_v58 = vpop.trf.xlu0 }
 0x172   : > { %1005 = vmatprep.mubr.msk.f32.mxu0 %vm416_vm1, %v460_v58  ;;  %v492_v17 = vpop.trf.xlu1 }
 0x175   : > { %v1176_v59 = vpop.trf.xlu0 }
 0x176   : > { %v493_v21 = vpop.trf.xlu1 }
 0x179   : > { %v1178_v60 = vpop.trf.xlu0 }
 0x17a   : > { %v494_v26 = vpop.trf.xlu1 }
 0x17d   : > { %v1180_v61 = vpop.trf.xlu0 }
 0x17e   : > { %v495_v27 = vpop.trf.xlu1 }
 0x181   : > { %v1182_v62 = vpop.trf.xlu0 }
 0x182   : > { %v496_v33 = vpop.trf.xlu1 }
 0x185   : > { %v1184_v63 = vpop.trf.xlu0 }
 0x186   : > { %v497_v37 = vpop.trf.xlu1 }
 0x189   : > { %v1186_v0 = vpop.trf.xlu0 }
 0x18a   : > { %v498_v41 = vpop.trf.xlu1 }
 0x18d   : > { %v1188_v1 = vpop.trf.xlu0 }
 0x18e   : > { %v499_v42 = vpop.trf.xlu1 }
 0x191   : > { %v1190_v2 = vpop.trf.xlu0 }
 0x192   : > { %v500_v45 = vpop.trf.xlu1 }
 0x195   : > { %v1192_v3 = vpop.trf.xlu0 }
 0x196   : > { %v501_v50 = vpop.trf.xlu1 }
 0x199   : > { %v1194_v4 = vpop.trf.xlu0 }
 0x19a   : > { %v502_v52 = vpop.trf.xlu1 }
 0x19d   : > { %v1196_v5 = vpop.trf.xlu0 }
 0x19e   : > { %v503_v53 = vpop.trf.xlu1 }
 0x1a1   : > { %v472_v6 = vpop.trf.xlu0 }
 0x1a2   : > { %1023 = vmatprep.mubr.msk.f32.mxu1 %vm416_vm1, %v472_v6  ;;  %v504_v54 = vpop.trf.xlu1 }
 0x1a5   : > { %v473_v43 = vpop.trf.xlu0 }
 0x1a6   : > { %v505_v55 = vpop.trf.xlu1 }
 0x1a9   : > { %v474_v49 = vpop.trf.xlu0 }
 0x1aa   : > { %v506_v56 = vpop.trf.xlu1 }
 0x1ad   : > { %v475_v51 = vpop.trf.xlu0 }
 0x1ae   : > { %v507_v57 = vpop.trf.xlu1 }
 0x1e3   : > { %v407_v7 = vpop.f32.mrb[0].mxu1 }
 0x1e4   : > { %v409_v8 = vpop.f32.mrb[1].mxu1  ;;  %v417_v10 = vsel %vm416_vm1, %v407_v7, -inf }
 0x1e7   : > { %v412_v9 = vpop.f32.mrb[2].mxu1 }
 0x1e8   : > { %v418_v11 = vsel %vm416_vm1, %v412_v9, -inf  ;;  %v414_v12 = vpop.f32.mrb[3].mxu1 }
 0x1e9   : > { %v419_v13 = vmax.f32 %v417_v10, %v418_v11 }
 0x1eb   : > { %v420_v14 = vrot.slane %v419_v13, 4 }
 0x1ed   : > { %v421_v15 = vmax.f32 %v419_v13, %v420_v14 }
 0x1ef   : > { %v422_v16 = vrot.slane %v421_v15, 2 }
 0x1f1   : > { %v423_v18 = vmax.f32 %v421_v15, %v422_v16 }
 0x1f3   : > { %v424_v19 = vrot.slane %v423_v18, 1 }
 0x1f5   : > { %v425_v20 = vmax.f32 %v423_v18, %v424_v19 }
 0x1f7   : > { %v426_v22 = vsub.f32 %v407_v7, %v425_v20  ;;  %v427_v23 = vsub.f32 %v412_v9, %v425_v20 }
 0x1f9   : > { %v428_v24 = vmul.f32 1.442695, %v426_v22  ;;  %v430_v25 = vmul.f32 1.442695, %v427_v23 }
 0x1fb   : > { %1083 = vpow2.f32 %v428_v24 }
 0x1fc   : > { %1085 = vpow2.f32 %v430_v25 }
 0x205   : > { %v1084_v28 = vpop.eup %1083 }
 0x206   : > { %v1086_v29 = vpop.eup %1085  ;;  %v432_v30 = vsel %vm416_vm1, %v1084_v28, 0.0 }
 0x207   : > { %v433_v31 = vsel %vm416_vm1, %v1086_v29, 0.0 }
 0x208   : > { %v434_v32 = vadd.f32 %v433_v31, %v432_v30 }
 0x20a   : > { %v435_v34 = vrot.slane %v434_v32, 4 }
 0x20c   : > { %v436_v35 = vadd.f32 %v435_v34, %v434_v32 }
 0x20e   : > { %v437_v36 = vrot.slane %v436_v35, 2 }
 0x210   : > { %v438_v38 = vadd.f32 %v437_v36, %v436_v35 }
 0x212   : > { %v439_v39 = vrot.slane %v438_v38, 1 }
 0x214   : > { %v440_v40 = vadd.f32 %v439_v39, %v438_v38 }
 0x216   : > { %1087 = vrcp.f32 %v440_v40 }
 0x220   : > { %v1088_v44 = vpop.eup %1087 }
 0x221   : > { %v442_v46 = vmul.f32 %v1088_v44, %v1084_v28  ;;  %v443_v47 = vmul.f32 %v1088_v44, %v1086_v29 }
 0x223   : > { %v1065_v48 = vpack.c.bf16 %v443_v47, %v442_v46 }
 0x225   : > { %1066 = vmatprep.subr.bf16.mxu0 %v1065_v48  ;;  %1069 = vmatprep.subr.bf16.mxu1 %v1065_v48 }
 0x226   : > { %1068 = vmatpush3.bf16.msra.mxu0 %v1065_v48  ;;  %1070 = vmatpush3.bf16.msra.mxu1 %v1065_v48 }
 0x229   : > { %1006 = vmatmul.mubr.msk.f32.vlgmr.msra.gmra.mrb[12].mxu0 %vm416_vm1, %v1176_v59  ;;  %1024 = vmatmul.mubr.msk.f32.vlgmr.msra.gmra.mrb[4].mxu1 %vm416_vm1, %v473_v43 }
 0x22a   : > { %1008 = vmatprep.mubr.msk.f32.mxu0 %vm416_vm1, %v1178_v60  ;;  %1026 = vmatprep.mubr.msk.f32.mxu1 %vm416_vm1, %v474_v49 }
 0x22d   : > { %1009 = vmatmul.mubr.msk.f32.gmra.mrb[14].mxu0 %vm416_vm1, %v1180_v61  ;;  %1027 = vmatmul.mubr.msk.f32.gmra.mrb[6].mxu1 %vm416_vm1, %v475_v51 }
 0x22e   : > { %1011 = vmatprep.mubr.msk.f32.mxu0 %vm416_vm1, %v1182_v62  ;;  %1029 = vmatprep.mubr.msk.f32.mxu1 %vm416_vm1, %v492_v17 }
 0x231   : > { %1012 = vmatmul.mubr.msk.f32.gmra.mrb[16].mxu0 %vm416_vm1, %v1184_v63  ;;  %1030 = vmatmul.mubr.msk.f32.gmra.mrb[8].mxu1 %vm416_vm1, %v493_v21 }
 0x232   : > { %1014 = vmatprep.mubr.msk.f32.mxu0 %vm416_vm1, %v1186_v0  ;;  %1032 = vmatprep.mubr.msk.f32.mxu1 %vm416_vm1, %v494_v26 }
 0x235   : > { %1015 = vmatmul.mubr.msk.f32.gmra.mrb[18].mxu0 %vm416_vm1, %v1188_v1  ;;  %1033 = vmatmul.mubr.msk.f32.gmra.mrb[10].mxu1 %vm416_vm1, %v495_v27 }
 0x236   : > { %1017 = vmatprep.mubr.msk.f32.mxu0 %vm416_vm1, %v1190_v2  ;;  %1035 = vmatprep.mubr.msk.f32.mxu1 %vm416_vm1, %v496_v33 }
 0x239   : > { %1018 = vmatmul.mubr.msk.f32.gmra.mrb[20].mxu0 %vm416_vm1, %v1192_v3  ;;  %1036 = vmatmul.mubr.msk.f32.gmra.mrb[12].mxu1 %vm416_vm1, %v497_v37 }
 0x23a   : > { %1020 = vmatprep.mubr.msk.f32.mxu0 %vm416_vm1, %v1194_v4  ;;  %1038 = vmatprep.mubr.msk.f32.mxu1 %vm416_vm1, %v498_v41 }
 0x23d   : > { %1021 = vmatmul.mubr.msk.f32.gmra.mrb[22].mxu0 %vm416_vm1, %v1196_v5  ;;  %1039 = vmatmul.mubr.msk.f32.gmra.mrb[14].mxu1 %vm416_vm1, %v499_v42 }
 0x23e   : > { %1041 = vmatprep.mubr.msk.f32.mxu1 %vm416_vm1, %v500_v45 }
 0x241   : > { %1042 = vmatmul.mubr.msk.f32.gmra.mrb[16].mxu1 %vm416_vm1, %v501_v50 }
 0x242   : > { %1044 = vmatprep.mubr.msk.f32.mxu1 %vm416_vm1, %v502_v52 }
 0x245   : > { %1045 = vmatmul.mubr.msk.f32.gmra.mrb[18].mxu1 %vm416_vm1, %v503_v53 }
 0x246   : > { %1047 = vmatprep.mubr.msk.f32.mxu1 %vm416_vm1, %v504_v54 }
 0x249   : > { %1048 = vmatmul.mubr.msk.f32.gmra.mrb[20].mxu1 %vm416_vm1, %v505_v55 }
 0x24a   : > { %1050 = vmatprep.mubr.msk.f32.mxu1 %vm416_vm1, %v506_v56 }
 0x24d   : > { %1051 = vmatmul.mubr.msk.f32.gmra.mrb[22].mxu1 %vm416_vm1, %v507_v57 }
 0x2fc   : > { %v1007_v58 = vpop.f32.mrb[12].mxu0  ;;  %v1025_v59 = vpop.f32.mrb[4].mxu1 }
 0x2fd   : > { %v670_v60 = vpop.f32.mrb[13].mxu0  ;;  %v730_v61 = vpop.f32.mrb[5].mxu1 }
 0x2fe   : > { %v829_v62 = vpack.c.bf16 %v1007_v58, %v670_v60  ;;  %v835_v63 = vpack.c.bf16 %v1025_v59, %v730_v61 }
 0x300   : > { %845 = vst.msk [vmem:[%s1248_s20] sm:$0xff] %vm416_vm1, %v829_v62  ;;  %851 = vst.msk [vmem:[%s1248_s20 + $0x30] sm:$0xff] %vm416_vm1, %v835_v63  ;;  %v1010_v0 = vpop.f32.mrb[14].mxu0  ;;  %v1028_v1 = vpop.f32.mrb[6].mxu1 }
 0x301   : > { %v680_v2 = vpop.f32.mrb[15].mxu0  ;;  %v740_v3 = vpop.f32.mrb[7].mxu1 }
 0x302   : > { %v830_v4 = vpack.c.bf16 %v1010_v0, %v680_v2  ;;  %v836_v5 = vpack.c.bf16 %v1028_v1, %v740_v3 }
 0x304   : > { %846 = vst.msk [vmem:[%s1248_s20 + $0x8] sm:$0xff] %vm416_vm1, %v830_v4  ;;  %852 = vst.msk [vmem:[%s1248_s20 + $0x38] sm:$0xff] %vm416_vm1, %v836_v5  ;;  %v1013_v6 = vpop.f32.mrb[16].mxu0  ;;  %v1031_v7 = vpop.f32.mrb[8].mxu1 }
 0x305   : > { %v690_v8 = vpop.f32.mrb[17].mxu0  ;;  %v750_v9 = vpop.f32.mrb[9].mxu1 }
 0x306   : > { %v831_v10 = vpack.c.bf16 %v1013_v6, %v690_v8  ;;  %v837_v11 = vpack.c.bf16 %v1031_v7, %v750_v9 }
 0x308   : > { %847 = vst.msk [vmem:[%s1248_s20 + $0x10] sm:$0xff] %vm416_vm1, %v831_v10  ;;  %853 = vst.msk [vmem:[%s1248_s20 + $0x40] sm:$0xff] %vm416_vm1, %v837_v11  ;;  %v1016_v12 = vpop.f32.mrb[18].mxu0  ;;  %v1034_v13 = vpop.f32.mrb[10].mxu1 }
 0x309   : > { %v700_v14 = vpop.f32.mrb[19].mxu0  ;;  %v760_v15 = vpop.f32.mrb[11].mxu1 }
 0x30a   : > { %v832_v16 = vpack.c.bf16 %v1016_v12, %v700_v14  ;;  %v838_v17 = vpack.c.bf16 %v1034_v13, %v760_v15 }
 0x30c   : > { %848 = vst.msk [vmem:[%s1248_s20 + $0x18] sm:$0xff] %vm416_vm1, %v832_v16  ;;  %854 = vst.msk [vmem:[%s1248_s20 + $0x48] sm:$0xff] %vm416_vm1, %v838_v17  ;;  %v1019_v18 = vpop.f32.mrb[20].mxu0  ;;  %v1037_v19 = vpop.f32.mrb[12].mxu1 }
 0x30d   : > { %v710_v20 = vpop.f32.mrb[21].mxu0  ;;  %v770_v21 = vpop.f32.mrb[13].mxu1 }
 0x30e   : > { %v833_v22 = vpack.c.bf16 %v1019_v18, %v710_v20  ;;  %v839_v23 = vpack.c.bf16 %v1037_v19, %v770_v21 }
 0x310   : > { %849 = vst.msk [vmem:[%s1248_s20 + $0x20] sm:$0xff] %vm416_vm1, %v833_v22  ;;  %855 = vst.msk [vmem:[%s1248_s20 + $0x50] sm:$0xff] %vm416_vm1, %v839_v23  ;;  %v1022_v24 = vpop.f32.mrb[22].mxu0  ;;  %v1040_v25 = vpop.f32.mrb[14].mxu1 }
 0x311   : > { %v720_v26 = vpop.f32.mrb[23].mxu0  ;;  %v780_v27 = vpop.f32.mrb[15].mxu1 }
 0x312   : > { %v834_v28 = vpack.c.bf16 %v1022_v24, %v720_v26  ;;  %v840_v29 = vpack.c.bf16 %v1040_v25, %v780_v27 }
 0x314   : > { %850 = vst.msk [vmem:[%s1248_s20 + $0x28] sm:$0xff] %vm416_vm1, %v834_v28  ;;  %856 = vst.msk [vmem:[%s1248_s20 + $0x58] sm:$0xff] %vm416_vm1, %v840_v29  ;;  %v1043_v30 = vpop.f32.mrb[16].mxu1 }
 0x315   : > { %v790_v31 = vpop.f32.mrb[17].mxu1 }
 0x316   : > { %v841_v32 = vpack.c.bf16 %v1043_v30, %v790_v31 }
 0x318   : > { %857 = vst.msk [vmem:[%s1248_s20 + $0x60] sm:$0xff] %vm416_vm1, %v841_v32  ;;  %v1046_v33 = vpop.f32.mrb[18].mxu1 }
 0x319   : > { %v800_v34 = vpop.f32.mrb[19].mxu1 }
 0x31a   : > { %v842_v35 = vpack.c.bf16 %v1046_v33, %v800_v34 }
 0x31c   : > { %858 = vst.msk [vmem:[%s1248_s20 + $0x68] sm:$0xff] %vm416_vm1, %v842_v35  ;;  %v1049_v36 = vpop.f32.mrb[20].mxu1 }
 0x31d   : > { %v810_v37 = vpop.f32.mrb[21].mxu1 }
 0x31e   : > { %v843_v38 = vpack.c.bf16 %v1049_v36, %v810_v37 }
 0x320   : > { %859 = vst.msk [vmem:[%s1248_s20 + $0x70] sm:$0xff] %vm416_vm1, %v843_v38  ;;  %v1052_v39 = vpop.f32.mrb[22].mxu1 }
 0x321   : > { %v820_v40 = vpop.f32.mrb[23].mxu1 }
 0x322   : > { %v844_v41 = vpack.c.bf16 %v1052_v39, %v820_v40 }
 0x324   : > { %860 = vst.msk [vmem:[%s1248_s20 + $0x78] sm:$0xff] %vm416_vm1, %v844_v41 }
 0x325 PF: > { %s13_s12 = sadd.s32 1, %s1095_s12  }
 0x326   : > { %p10_p4 = scmp.ge.s32.totalorder %s13_s12, 4  }
 0x328   :  { %12 = sbr.rel (!%p10_p4) target bundleno = 1 (0x1), region = 62 }

// kernel: non_local_block.3
= control target key start
LH: loop header
LB: loop body
LE: loop exit
PB: predicated region body
PF: predicated region fallthrough
CT: control target
= control target key end

     0   :  { %s720_s18 = smov 0   ;;  %s722_s19 = smov 0   ;;  %s816_s0 = inlined_call_operand.vmem [shape: f32[2,32,256], index: 0, kind: input, shape index: {}]   ;;  %s817_s1 = inlined_call_operand.vmem [shape: bf16[2,16,256], index: 1, kind: input, shape index: {}]   ;;  %s818_s2 = inlined_call_operand.vmem [shape: f32[32,16], index: 2, kind: input, shape index: {}]   ;;  %s819_s3 = inlined_call_operand.vmem [shape: f32[32,1], index: 3, kind: input, shape index: {}]   ;;  %s820_s4 = inlined_call_operand.vmem [shape: f32[32,1], index: 4, kind: input, shape index: {}]   ;;  %s821_s5 = inlined_call_operand.vmem [shape: f32[2,32,256], index: 5, kind: output, shape index: {}]  }
   0x1   :  { %s724_s20 = smov 0  }
   0x2 LB: > { %s27_s21 = sadd.s32 1, %s682_s19  ;;  %p609_p0 = scmp.ge.s32.totalorder %s686_s20, 1  ;;  %s686_s20 = sphi %s724_s20, %s15_s20   ;;  %s682_s19 = sphi %s722_s19, %s823_s19   ;;  %s678_s18 = sphi %s720_s18, %s822_s18  }
   0x3   : > { %p29_p1 = scmp.ge.s32.totalorder %s27_s21, 2  ;;  %p225_p2 = scmp.lt.s32.totalorder %s686_s20, 3 }
   0x5   : > { %s825_s21 = smov (%p29_p1, %s27_s21), 0  ;;  %p226_p3 = pnand %p609_p0, %p225_p2 }
   0x6   : > { %p271_p4 = scmp.lt.s32.totalorder (!%p226_p3), %s678_s18, 1  ;;  %v688_v0 = vmov (!%p226_p3), 0.0   ;;  %v422_v1 = vld [vmem:[%s819_s3 + $0x10] sm:$0xff] (!%p226_p3)  ;;  %v420_v2 = vld [vmem:[%s819_s3] sm:$0xff] (!%p226_p3)  ;;  %v689_v3 = vmov (!%p226_p3), 0   ;;  %v423_v4 = vld [vmem:[%s819_s3 + $0x18] sm:$0xff] (!%p226_p3) }
   0x7   : > { %229 = sbr.rel (%p226_p3) target bundleno = 246 (0xf6), region = 40  ;;  %387 = vmatprep.mubr.f32.mxu0 (!%p226_p3), %v688_v0  ;;  %399 = vmatprep.mubr.f32.mxu1 (!%p226_p3), %v688_v0  ;;  %v421_v5 = vld [vmem:[%s819_s3 + $0x8] sm:$0xff] (!%p226_p3)  ;;  %v460_v9 = vld [vmem:[%s820_s4] sm:$0xff] (!%p226_p3)  ;;  %vm310_vm0 = vcmask (!%p226_p3), 130048   ;;  %v308_v11 = vld [vmem:[%s818_s2 + $0x10] sm:$0xff] (!%p226_p3) }
   0x8   : > { %660 = vset.pattern.permute.xlu1 (!%p226_p3), %v689_v3  ;;  %659 = vset.pattern.permute.xlu0 (!%p226_p3), %v689_v3  ;;  %v461_v8 = vld [vmem:[%s820_s4 + $0x8] sm:$0xff] (!%p226_p3)  ;;  %v306_v10 = vld [vmem:[%s818_s2] sm:$0xff] (!%p226_p3)  ;;  %v463_v12 = vld [vmem:[%s820_s4 + $0x18] sm:$0xff] (!%p226_p3) }
   0x9   : > { %436 = vperm.xlu1 (!%p226_p3), %660, %v422_v1   ;;  %426 = vperm.xlu0 (!%p226_p3), %659, %v420_v2   ;;  %v462_v13 = vld [vmem:[%s820_s4 + $0x10] sm:$0xff] (!%p226_p3)  ;;  %v307_v14 = vld [vmem:[%s818_s2 + $0x8] sm:$0xff] (!%p226_p3)  ;;  %v309_v15 = vld [vmem:[%s818_s2 + $0x18] sm:$0xff] (!%p226_p3) }
   0xd   : > { %441 = vperm.xlu1 (!%p226_p3), %660, %v423_v4   ;;  %431 = vperm.xlu0 (!%p226_p3), %659, %v421_v5  }
   0xe   : > { %s827_s18 = smov (!%p271_p4, %s678_s18), 1 }
   0xf   : > { %s623_s26 = sshll.u32 %s827_s18, 4  ;;  %s622_s29 = sshll.u32 %s827_s18, 6 }
  0x10   : > { %s288_s8 = scalar_lea.vmem %s817_s1, %s623_s26  ;;  %s784_s7 = scalar_lea.vmem %s816_s0, %s622_s29 }
  0x11   : > { %v661_v6 = vld [vmem:[%s288_s8 + $0x4] ss:$8 sps:$4 sm:$0xff]   ;;  %v663_v7 = vld [vmem:[%s288_s8] ss:$8 sps:$4 sm:$0xff]   ;;  %471 = vperm.xlu1 %660, %v461_v8   ;;  %466 = vperm.xlu0 %659, %v460_v9   ;;  %s793_s9 = scalar_lea.vmem %s821_s5, %s622_s29  ;;  %v414_v40 = vld [vmem:[%s784_s7 + $0x10] sm:$0xff] }
  0x12   : > { %626 = vmatprep.subr.bf16.mxu0 %v661_v6  ;;  %629 = vmatprep.subr.bf16.mxu1 %v661_v6  ;;  %v412_v22 = vld [vmem:[%s784_s7] sm:$0xff]  ;;  %v413_v28 = vld [vmem:[%s784_s7 + $0x8] sm:$0xff]  ;;  %v418_v42 = vld [vmem:[%s784_s7 + $0x30] sm:$0xff] }
  0x13   : > { %628 = vmatpush1.bf16.msra.mxu0 %v663_v7  ;;  %630 = vmatpush1.bf16.msra.mxu1 %v663_v7  ;;  %v416_v24 = vld [vmem:[%s784_s7 + $0x20] sm:$0xff]  ;;  %v417_v30 = vld [vmem:[%s784_s7 + $0x28] sm:$0xff]  ;;  %v415_v48 = vld [vmem:[%s784_s7 + $0x18] sm:$0xff] }
  0x14   : > { %v419_v50 = vld [vmem:[%s784_s7 + $0x38] sm:$0xff] }
  0x15   : > { %481 = vperm.xlu1 %660, %v463_v12   ;;  %476 = vperm.xlu0 %659, %v462_v13  }
  0x16   : > { %616 = vmatmul.mubr.msk.f32.vlgmr.msra.gmra.mrb[0].mxu0 %vm310_vm0, %v306_v10  ;;  %618 = vmatmul.mubr.msk.f32.vlgmr.msra.gmra.mrb[0].mxu1 %vm310_vm0, %v308_v11 }
  0x17   : > { %393 = vmatprep.mubr.f32.mxu0 %v688_v0  ;;  %405 = vmatprep.mubr.f32.mxu1 %v688_v0 }
  0x1a   : > { %617 = vmatmul.mubr.msk.f32.gmra.mrb[2].mxu0 %vm310_vm0, %v307_v14  ;;  %619 = vmatmul.mubr.msk.f32.gmra.mrb[2].mxu1 %vm310_vm0, %v309_v15 }
  0x88   : > { %v427_v16 = vpop.permute.xlu0 %426  ;;  %v437_v17 = vpop.permute.xlu1 %436 }
  0x8c   : > { %v432_v18 = vpop.permute.xlu0 %431  ;;  %v442_v19 = vpop.permute.xlu1 %441 }
  0x90   : > { %v467_v20 = vpop.permute.xlu0 %466  ;;  %v472_v31 = vpop.permute.xlu1 %471 }
  0x94   : > { %v477_v34 = vpop.permute.xlu0 %476  ;;  %v482_v57 = vpop.permute.xlu1 %481 }
  0xe9   : > { %v389_v21 = vpop.f32.mrb[0].mxu0  ;;  %v401_v23 = vpop.f32.mrb[0].mxu1 }
  0xea   : > { %v444_v25 = vmul.f32 %v427_v16, %v389_v21  ;;  %v448_v26 = vmul.f32 %v437_v17, %v401_v23  ;;  %v391_v27 = vpop.f32.mrb[1].mxu0  ;;  %v403_v29 = vpop.f32.mrb[1].mxu1 }
  0xeb   : > { %v445_v32 = vmul.f32 %v427_v16, %v391_v27  ;;  %v449_v33 = vmul.f32 %v437_v17, %v403_v29 }
  0xec   : > { %v452_v35 = vadd.f32 %v444_v25, %v412_v22  ;;  %v456_v36 = vadd.f32 %v448_v26, %v416_v24 }
  0xed   : > { %v453_v37 = vadd.f32 %v445_v32, %v413_v28  ;;  %v457_v38 = vadd.f32 %v449_v33, %v417_v30  ;;  %v395_v39 = vpop.f32.mrb[2].mxu0  ;;  %v407_v41 = vpop.f32.mrb[2].mxu1 }
  0xee   : > { %v484_v43 = vadd.f32 %v467_v20, %v452_v35  ;;  %v488_v44 = vadd.f32 %v477_v34, %v456_v36  ;;  %v446_v45 = vmul.f32 %v432_v18, %v395_v39  ;;  %v450_v46 = vmul.f32 %v442_v19, %v407_v41  ;;  %v397_v47 = vpop.f32.mrb[3].mxu0  ;;  %v409_v49 = vpop.f32.mrb[3].mxu1 }
  0xef   : > { %v485_v51 = vadd.f32 %v467_v20, %v453_v37  ;;  %v489_v52 = vadd.f32 %v477_v34, %v457_v38  ;;  %v447_v53 = vmul.f32 %v432_v18, %v397_v47  ;;  %v451_v54 = vmul.f32 %v442_v19, %v409_v49 }
  0xf0   : > { %492 = vst [vmem:[%s793_s9] sm:$0xff] %v484_v43  ;;  %496 = vst [vmem:[%s793_s9 + $0x20] sm:$0xff] %v488_v44  ;;  %v454_v55 = vadd.f32 %v446_v45, %v414_v40  ;;  %v458_v56 = vadd.f32 %v450_v46, %v418_v42 }
  0xf1   : > { %493 = vst [vmem:[%s793_s9 + $0x8] sm:$0xff] %v485_v51  ;;  %497 = vst [vmem:[%s793_s9 + $0x28] sm:$0xff] %v489_v52  ;;  %v455_v58 = vadd.f32 %v447_v53, %v415_v48  ;;  %v459_v59 = vadd.f32 %v451_v54, %v419_v50 }
  0xf2   : > { %v486_v60 = vadd.f32 %v472_v31, %v454_v55  ;;  %v490_v61 = vadd.f32 %v482_v57, %v458_v56 }
  0xf3   : > { %v487_v62 = vadd.f32 %v472_v31, %v455_v58  ;;  %v491_v63 = vadd.f32 %v482_v57, %v459_v59 }
  0xf4   : > { %494 = vst [vmem:[%s793_s9 + $0x10] sm:$0xff] %v486_v60  ;;  %498 = vst [vmem:[%s793_s9 + $0x30] sm:$0xff] %v490_v61 }
  0xf5   : > { %495 = vst [vmem:[%s793_s9 + $0x18] sm:$0xff] %v487_v62  ;;  %499 = vst [vmem:[%s793_s9 + $0x38] sm:$0xff] %v491_v63 }
  0xf6 PF: > { %s15_s20 = sadd.s32 1, %s686_s20   ;;  %s822_s18 = smov %s682_s19 }
  0xf7   : > { %p12_p5 = scmp.ge.s32.totalorder %s15_s20, 4   ;;  %s823_s19 = smov %s825_s21 }
  0xf9   :  { %14 = sbr.rel (!%p12_p5) target bundleno = 2 (0x2), region = 73 }

</bundles_post_ra>
